<compile_context>
chip_gen: v7x
topology: tpu7x:2x2x1
jax: 0.10.0
libtpu: 0.0.40
codegen_flags: <defaults>
</compile_context>

<pallas_src>
import functools

import numpy as np
import jax
import jax.numpy as jnp
from jax.experimental import pallas as pl
from jax.experimental.pallas import tpu as pltpu


def _cdiv(a, b):
    return -(-a // b)


def _moving_avg_weights(t, kernel_size, pad):
    """(T, T) f32 matrix: mean = W @ x, replicate padding + 1/k folded in."""
    pos = np.arange(t + 2 * pad)
    src = np.clip(pos - pad, 0, t - 1)
    onehot = np.zeros((t + 2 * pad, t), np.float32)
    onehot[pos, src] = 1.0
    out = np.arange(t)[:, None]
    band = (pos[None, :] >= out) & (pos[None, :] < out + kernel_size)
    return (band.astype(np.float32) @ onehot) / np.float32(kernel_size)


# ----------------------------- kernels -------------------------------------


def _tap_kernel(x_ref, mean_ref, *res_refs, kernel_size, pad):
    """Unrolled-tap replicate-padded moving average (small kernel_size)."""
    x = x_ref[...]                                      # (TB, T, TN), in dtype
    tb, t, tn = x.shape
    if pad > 0:
        first = jnp.broadcast_to(x[:, 0:1, :], (tb, pad, tn))
        last = jnp.broadcast_to(x[:, t - 1:t, :], (tb, pad, tn))
        xp = jnp.concatenate([first, x, last], axis=1)  # (TB, T + 2*pad, TN)
    else:
        xp = x
    # Keep xp in the input dtype (bf16 stays packed); accumulate in f32.
    wsum = xp[:, 0:t, :].astype(jnp.float32)
    for j in range(1, kernel_size):                     # static unroll, small k
        wsum = wsum + xp[:, j:j + t, :].astype(jnp.float32)
    mean = wsum * jnp.float32(1.0 / kernel_size)
    mean_ref[...] = mean.astype(mean_ref.dtype)
    if res_refs:
        res_refs[0][...] = (x.astype(jnp.float32) - mean).astype(res_refs[0].dtype)


def _matmul_kernel(w_ref, x_ref, mean_ref, *res_refs):
    """Banded-weight moving average on the MXU (large kernel_size).

    w_ref: (T, T) weights with replicate padding + 1/k folded in (constant,
    VMEM-resident).  One (T, T) x (T, TN) matmul per batch row of the block.
    """
    w = w_ref[...]
    tb = x_ref.shape[0]

    def one_row(b):
        xb = x_ref[b]                                   # (T, TN)
        m = jnp.dot(w, xb.astype(w.dtype), preferred_element_type=jnp.float32)
        mean_ref[b] = m.astype(mean_ref.dtype)
        if res_refs:
            res_refs[0][b] = (xb.astype(jnp.float32) - m).astype(res_refs[0].dtype)

    if tb <= 8:
        for b in range(tb):                             # static unroll
            one_row(b)
    else:
        def body(b, carry):
            one_row(b)
            return carry
        jax.lax.fori_loop(0, tb, body, 0)


# --------------------------- tiling / planning ------------------------------


def _choose_lane_tile(n):
    # TODO(synk): lane-sparse N (not a multiple of 128) leaves vregs/stores
    # underutilized; a lane-dense layout would need wrapper transposes (extra
    # HBM passes), so the natural (B, T, N) layout is kept.
    if n % 128 == 0:
        for t in (512, 256, 128):
            if n % t == 0:
                return t
    return n  # full lane dim (legal; masked stores for the non-128 tail)


def _vmem_capacity_bytes():
    try:
        return int(pltpu.get_tpu_info().vmem_capacity_bytes)
    except Exception:
        return 64 << 20  # conservative (v7x-sized) fallback


def _plan_tiles(b, t, n, itemsize, pad, n_outputs, use_matmul, w_itemsize):
    tn = _choose_lane_tile(n)
    vmem_cap = _vmem_capacity_bytes()
    vmem_limit_cap = min(int(vmem_cap * 0.65), 100 << 20)
    # MiB-scale blocks amortize the ~0.35us/grid-step overhead; scale the
    # budget with VMEM capacity (larger on 128 MiB v5e/v6e than 64 MiB v7x).
    budget = max(1 << 20, min(8 << 20, vmem_cap // 24))

    io_row = 2 * (1 + n_outputs) * t * tn * itemsize    # double-buffered I/O
    if use_matmul:
        work_row = 2 * t * tn * 4                       # f32 temporaries
    else:
        work_row = (t + 2 * pad) * tn * itemsize + 2 * t * tn * 4
    row_bytes = io_row + work_row
    fixed = (2 * t * t * w_itemsize if use_matmul else 0) + (4 << 20)

    tb_budget = max(1, budget // max(1, t * tn * itemsize))
    tb_fit = max(1, (vmem_limit_cap - fixed) // row_bytes)
    tb = int(max(1, min(b, tb_budget, tb_fit, 1024)))

    # Guarantee >= 2 grid steps along a parallel axis when possible (v7x has
    # two TensorCores sharded across parallel grid axes).
    if _cdiv(b, tb) * _cdiv(n, tn) < 2:
        if b >= 2:
            tb = _cdiv(b, 2)
        elif tn % 256 == 0:
            tn = tn // 2

    vmem_limit = int(min(vmem_limit_cap, tb * row_bytes + fixed))
    vmem_limit = max(vmem_limit, 16 << 20)
    return tb, tn, vmem_limit


# ------------------------------ wrappers ------------------------------------


def series_decomp_decompose(x, kernel_size, with_residual=True):
    """Replicate-padded moving average (stride 1) along T.  x: (B, T, N, 1).

    Returns (moving_mean, residual) when with_residual else moving_mean only,
    each shaped (B, T, N, 1).  The mean-only path writes no residual to HBM.
    """
    assert x.ndim == 4 and x.shape[-1] == 1, x.shape
    assert kernel_size >= 1 and kernel_size % 2 == 1, kernel_size
    B, T, N, _ = x.shape
    pad = (kernel_size - 1) // 2
    x3 = x.reshape(B, T, N)                  # free: drop trailing size-1 dim
    itemsize = jnp.dtype(x.dtype).itemsize

    # Large k: banded MXU matmul (exact weights, no pad concat, no scan);
    # small k: unrolled taps.  W must fit comfortably in VMEM.
    use_matmul = kernel_size > 8 and T <= 512
    w_dtype = jnp.float32 if itemsize >= 4 else x.dtype
    n_outputs = 2 if with_residual else 1

    TB, TN, vmem_limit = _plan_tiles(
        B, T, N, itemsize, pad, n_outputs, use_matmul,
        jnp.dtype(w_dtype).itemsize if use_matmul else 0)
    grid = (_cdiv(B, TB), _cdiv(N, TN))

    block = (TB, T, TN)
    x_spec = pl.BlockSpec(block, lambda i, j: (i, 0, j))
    out_spec = pl.BlockSpec(block, lambda i, j: (i, 0, j))

    if with_residual:
        out_shape = (jax.ShapeDtypeStruct((B, T, N), x.dtype),
                     jax.ShapeDtypeStruct((B, T, N), x.dtype))
        out_specs = (out_spec, out_spec)
    else:
        out_shape = jax.ShapeDtypeStruct((B, T, N), x.dtype)
        out_specs = out_spec

    if use_matmul:
        w = jnp.asarray(_moving_avg_weights(T, kernel_size, pad), dtype=w_dtype)
        in_specs = [pl.BlockSpec((T, T), lambda i, j: (0, 0)), x_spec]
        kernel = _matmul_kernel
        args = (w, x3)
    else:
        in_specs = [x_spec]
        kernel = functools.partial(_tap_kernel, kernel_size=kernel_size, pad=pad)
        args = (x3,)

    out = pl.pallas_call(
        kernel,
        out_shape=out_shape,
        grid_spec=pltpu.PrefetchScalarGridSpec(
            num_scalar_prefetch=0,
            grid=grid,
            in_specs=in_specs,
            out_specs=out_specs),
        compiler_params=pltpu.CompilerParams(
            dimension_semantics=("parallel", "parallel"),
            vmem_limit_bytes=vmem_limit),
    )(*args)

    if with_residual:
        mean, res = out
        return mean.reshape(B, T, N, 1), res.reshape(B, T, N, 1)
    return out.reshape(B, T, N, 1)


def series_decomp(x, kernel_size):
    """Matches series_decomp.forward: returns only moving_mean, (B, T, N, 1).

    The PyTorch forward computes the residual but does not return it, so this
    path skips the residual HBM writeback entirely (mean-only kernel).
    """
    return series_decomp_decompose(x, kernel_size, with_residual=False)


# ------------------------------ reference -----------------------------------


def _reference_series_decomp(x, kernel_size):
    """Pure-JAX reference mirroring the PyTorch forward."""
    B, T, N, _ = x.shape
    xs = x[..., 0].astype(jnp.float32)
    pad = (kernel_size - 1) // 2
    front = jnp.repeat(xs[:, :1, :], pad, axis=1)
    end = jnp.repeat(xs[:, -1:, :], pad, axis=1)
    xp = jnp.concatenate([front, xs, end], axis=1)
    mean = jnp.stack(
        [xp[:, i:i + kernel_size, :].mean(axis=1) for i in range(T)], axis=1)
    mean = mean[..., None].astype(x.dtype)
    return mean, x - mean


if __name__ == "__main__":
    key = jax.random.PRNGKey(0)
    k1, k2 = jax.random.split(key)

    # Config 1: small module-like shape, kernel_size=5 -> unrolled-tap path.
    B1, T1, N1, ks1 = 2, 16, 4, 5
    x1 = jax.random.normal(k1, (B1, T1, N1, 1), dtype=jnp.float32)
    mean1, res1 = jax.block_until_ready(
        series_decomp_decompose(x1, ks1, with_residual=True))
    ref_m1, ref_r1 = _reference_series_decomp(x1, ks1)
    assert mean1.shape == (B1, T1, N1, 1), mean1.shape
    assert jnp.allclose(mean1, ref_m1, atol=1e-5, rtol=1e-5), "mean mismatch (taps)"
    assert jnp.allclose(res1, ref_r1, atol=1e-5, rtol=1e-5), "res mismatch (taps)"

    # Module forward (mean only; no residual HBM writeback on this path).
    fwd1 = jax.block_until_ready(series_decomp(x1, ks1))
    assert fwd1.shape == (B1, T1, N1, 1), fwd1.shape
    assert jnp.allclose(fwd1, ref_m1, atol=1e-5, rtol=1e-5), "forward mismatch"

    # Config 2: typical large kernel_size -> banded-weight MXU path; lane-dense
    # N and a batch that does not divide the tile (exercises the cdiv tail).
    B2, T2, N2, ks2 = 3, 64, 128, 25
    x2 = jax.random.normal(k2, (B2, T2, N2, 1), dtype=jnp.float32)
    mean2, res2 = jax.block_until_ready(
        series_decomp_decompose(x2, ks2, with_residual=True))
    ref_m2, ref_r2 = _reference_series_decomp(x2, ks2)
    # Typical error is ~1e-6; loose tolerance also covers reduced-precision
    # MXU passes on f32 operands while still catching structural bugs.
    assert jnp.allclose(mean2, ref_m2, atol=5e-3, rtol=5e-3), "mean mismatch (mxu)"
    assert jnp.allclose(res2, ref_r2, atol=5e-3, rtol=5e-3), "res mismatch (mxu)"
    fwd2 = jax.block_until_ready(series_decomp(x2, ks2))
    assert jnp.allclose(fwd2, ref_m2, atol=5e-3, rtol=5e-3), "forward mismatch (mxu)"

    print("KERNEL_OK")
</pallas_src>

<mosaic_0001>
module attributes {stable_mosaic.version = 11 : i64} {
  func.func @_tap_kernel(%arg0: i32, %arg1: i32, %arg2: memref<1x16x4xf32, #tpu.memory_space<vmem>>, %arg3: memref<1x16x4xf32, #tpu.memory_space<vmem>>, %arg4: memref<1x16x4xf32, #tpu.memory_space<vmem>>) attributes {dimension_semantics = [#tpu.dimension_semantics<parallel>, #tpu.dimension_semantics<parallel>], iteration_bounds = array<i64: 2, 1>, scalar_prefetch = 0 : i64, scratch_operands = 0 : i64, tpu.core_type = #tpu.core_type<tc>, window_params = [{transform_indices = @transform_0, window_bounds = array<i64: 1, 16, 4>}, {transform_indices = @transform_1, window_bounds = array<i64: 1, 16, 4>}, {transform_indices = @transform_2, window_bounds = array<i64: 1, 16, 4>}]} {
    %c0 = arith.constant 0 : index
    %c0_0 = arith.constant 0 : index
    %c0_1 = arith.constant 0 : index
    %0 = vector.load %arg2[%c0, %c0_0, %c0_1] : memref<1x16x4xf32, #tpu.memory_space<vmem>>, vector<1x16x4xf32>
    %1 = vector.extract_strided_slice %0 {offsets = [0, 0, 0], sizes = [1, 1, 4], strides = [1, 1, 1]} : vector<1x16x4xf32> to vector<1x1x4xf32>
    %2 = vector.shape_cast %1 : vector<1x1x4xf32> to vector<1x1x4xf32>
    %3 = vector.broadcast %2 : vector<1x1x4xf32> to vector<1x2x4xf32>
    %4 = vector.extract_strided_slice %0 {offsets = [0, 15, 0], sizes = [1, 1, 4], strides = [1, 1, 1]} : vector<1x16x4xf32> to vector<1x1x4xf32>
    %5 = vector.shape_cast %4 : vector<1x1x4xf32> to vector<1x1x4xf32>
    %6 = vector.broadcast %5 : vector<1x1x4xf32> to vector<1x2x4xf32>
    %7 = tpu.concatenate %3, %0, %6 in 1 : vector<1x2x4xf32>, vector<1x16x4xf32>, vector<1x2x4xf32> -> vector<1x20x4xf32>
    %8 = vector.extract_strided_slice %7 {offsets = [0, 0, 0], sizes = [1, 16, 4], strides = [1, 1, 1]} : vector<1x20x4xf32> to vector<1x16x4xf32>
    %9 = vector.extract_strided_slice %7 {offsets = [0, 1, 0], sizes = [1, 16, 4], strides = [1, 1, 1]} : vector<1x20x4xf32> to vector<1x16x4xf32>
    %10 = arith.addf %8, %9 : vector<1x16x4xf32>
    %11 = vector.extract_strided_slice %7 {offsets = [0, 2, 0], sizes = [1, 16, 4], strides = [1, 1, 1]} : vector<1x20x4xf32> to vector<1x16x4xf32>
    %12 = arith.addf %10, %11 : vector<1x16x4xf32>
    %13 = vector.extract_strided_slice %7 {offsets = [0, 3, 0], sizes = [1, 16, 4], strides = [1, 1, 1]} : vector<1x20x4xf32> to vector<1x16x4xf32>
    %14 = arith.addf %12, %13 : vector<1x16x4xf32>
    %15 = vector.extract_strided_slice %7 {offsets = [0, 4, 0], sizes = [1, 16, 4], strides = [1, 1, 1]} : vector<1x20x4xf32> to vector<1x16x4xf32>
    %16 = arith.addf %14, %15 : vector<1x16x4xf32>
    %cst = arith.constant 2.000000e-01 : f32
    %17 = vector.broadcast %cst : f32 to vector<1x16x4xf32>
    %18 = arith.mulf %16, %17 : vector<1x16x4xf32>
    %c0_2 = arith.constant 0 : index
    %c0_3 = arith.constant 0 : index
    %c0_4 = arith.constant 0 : index
    %19 = vector.load %arg3[%c0_2, %c0_3, %c0_4] : memref<1x16x4xf32, #tpu.memory_space<vmem>>, vector<1x16x4xf32>
    tpu.vector_store %arg3[%c0_2, %c0_3, %c0_4], %18 {strides = array<i32>} : memref<1x16x4xf32, #tpu.memory_space<vmem>>, vector<1x16x4xf32>,
    %20 = arith.subf %0, %18 : vector<1x16x4xf32>
    %c0_5 = arith.constant 0 : index
    %c0_6 = arith.constant 0 : index
    %c0_7 = arith.constant 0 : index
    %21 = vector.load %arg4[%c0_5, %c0_6, %c0_7] : memref<1x16x4xf32, #tpu.memory_space<vmem>>, vector<1x16x4xf32>
    tpu.vector_store %arg4[%c0_5, %c0_6, %c0_7], %20 {strides = array<i32>} : memref<1x16x4xf32, #tpu.memory_space<vmem>>, vector<1x16x4xf32>,
    return
  }
  func.func @transform_0(%arg0: i32, %arg1: i32) -> (i32, i32, i32) {
    %c0_i32 = arith.constant 0 : i32
    %c0_i32_0 = arith.constant 0 : i32
    return %arg0, %c0_i32, %arg1 : i32, i32, i32
  }
  func.func @transform_1(%arg0: i32, %arg1: i32) -> (i32, i32, i32) {
    %c0_i32 = arith.constant 0 : i32
    %c0_i32_0 = arith.constant 0 : i32
    return %arg0, %c0_i32, %arg1 : i32, i32, i32
  }
  func.func @transform_2(%arg0: i32, %arg1: i32) -> (i32, i32, i32) {
    %c0_i32 = arith.constant 0 : i32
    %c0_i32_0 = arith.constant 0 : i32
    return %arg0, %c0_i32, %arg1 : i32, i32, i32
  }
}

</mosaic_0001>

<bundles_post_ra>
// kernel: tpu_custom_call.1
= control target key start
LH: loop header
LB: loop body
LE: loop exit
PB: predicated region body
PF: predicated region fallthrough
CT: control target
= control target key end

     0   :  { %s477_s9 = smov 0   ;;  %s479_s10 = smov 0   ;;  %s524_s0 = inlined_call_operand.vmem [shape: f32[2,16,4], index: 0, kind: input, shape index: {}]   ;;  %s525_s1 = inlined_call_operand.vmem [shape: f32[2,16,4], index: 1, kind: output, shape index: {0}]   ;;  %s526_s2 = inlined_call_operand.vmem [shape: f32[2,16,4], index: 2, kind: output, shape index: {1}]  }
   0x1   :  { %s481_s11 = smov 0  }
   0x2 LB: > { %s25_s12 = sadd.s32 1, %s456_s10  ;;  %p402_p0 = scmp.ge.s32.totalorder %s460_s11, 1  ;;  %s460_s11 = sphi %s481_s11, %s13_s11   ;;  %s456_s10 = sphi %s479_s10, %s528_s10   ;;  %s452_s9 = sphi %s477_s9, %s527_s9  }
   0x3   : > { %p27_p1 = scmp.ge.s32.totalorder %s25_s12, 2  ;;  %p136_p2 = scmp.lt.s32.totalorder %s460_s11, 3 }
   0x5   : > { %s530_s12 = smov (%p27_p1, %s25_s12), 0  ;;  %p137_p3 = pnand %p402_p0, %p136_p2 }
   0x6   : > { %p172_p4 = scmp.lt.s32.totalorder (!%p137_p3), %s452_s9, 1  ;;  %v198_v0 = vlaneseq (!%p137_p3)  ;;  %vm208_vm0 = vcmask (!%p137_p3), 1041408   ;;  %vm219_vm1 = vcmask (!%p137_p3), 1046528   ;;  %vm229_vm2 = vcmask (!%p137_p3), 1045504  }
   0x7   : > { %140 = sbr.rel (%p137_p3) target bundleno = 39 (0x27), region = 24  ;;  %vm239_vm3 = vcmask (!%p137_p3), 1044480   ;;  %vm249_vm4 = vcmask (!%p137_p3), 1043456   ;;  %vm261_vm5 = vcmask (!%p137_p3), 31744  }
   0x8   : > { %v199_v1 = vshrl.u32 (!%p137_p3), %v198_v0, 7 }
   0xa   : > { %v200_v2 = vsub.s32 (!%p137_p3), 0, %v199_v1  ;;  %v204_v3 = vsub.s32 (!%p137_p3), 7, %v199_v1 }
   0xe   : > { %s532_s9 = smov (!%p172_p4, %s452_s9), 1 }
   0xf   : > { %s495_s13 = sshll.u32 %s532_s9, 4 }
  0x10   : > { %s179_s16 = scalar_lea.vmem %s524_s0, %s495_s13  ;;  %s187_s19 = scalar_lea.vmem %s525_s1, %s495_s13 }
  0x11   : > { %v196_v4 = vld [vmem:[%s179_s16] sm:$0xff]  ;;  %v197_v5 = vld [vmem:[%s179_s16 + $0x8] sm:$0xff]  ;;  %s195_s22 = scalar_lea.vmem %s526_s2, %s495_s13 }
  0x12   : > { %v201_v6 = vrot.slane %v196_v4, %v200_v2  ;;  %v205_v7 = vrot.slane %v197_v5, %v204_v3  ;;  %v209_v8 = vrot.slane %v196_v4, 6  ;;  %v210_v9 = vrot.slane %v197_v5, 6 }
  0x14   : > { %v211_v10 = vsel %vm208_vm0, %v209_v8, %v210_v9  ;;  %v215_v11 = vsel %vm208_vm0, %v201_v6, %v209_v8  ;;  %v216_v12 = vsel %vm208_vm0, %v210_v9, %v205_v7 }
  0x15   : > { %v220_v13 = vrot.slane %v215_v11, 1  ;;  %v221_v14 = vrot.slane %v211_v10, 1  ;;  %v230_v15 = vrot.slane %v215_v11, 2  ;;  %v231_v16 = vrot.slane %v211_v10, 2 }
  0x16   : > { %v240_v17 = vrot.slane %v215_v11, 3  ;;  %v241_v18 = vrot.slane %v211_v10, 3  ;;  %v250_v19 = vrot.slane %v215_v11, 4  ;;  %v251_v20 = vrot.slane %v211_v10, 4 }
  0x17   : > { %v222_v21 = vsel %vm219_vm1, %v220_v13, %v221_v14  ;;  %v232_v22 = vsel %vm229_vm2, %v230_v15, %v231_v16  ;;  %v223_v23 = vrot.slane %v216_v12, 1  ;;  %v233_v24 = vrot.slane %v216_v12, 2 }
  0x18   : > { %v227_v25 = vadd.f32 %v222_v21, %v215_v11  ;;  %v243_v26 = vrot.slane %v216_v12, 3  ;;  %v242_v27 = vsel %vm239_vm3, %v240_v17, %v241_v18  ;;  %v253_v30 = vrot.slane %v216_v12, 4 }
  0x19   : > { %v224_v28 = vsel %vm219_vm1, %v221_v14, %v223_v23  ;;  %v234_v29 = vsel %vm229_vm2, %v231_v16, %v233_v24  ;;  %v252_v33 = vsel %vm249_vm4, %v250_v19, %v251_v20 }
  0x1a   : > { %v237_v31 = vadd.f32 %v232_v22, %v227_v25  ;;  %v228_v32 = vadd.f32 %v224_v28, %v211_v10  ;;  %v244_v34 = vsel %vm239_vm3, %v241_v18, %v243_v26  ;;  %v254_v37 = vsel %vm249_vm4, %v251_v20, %v253_v30 }
  0x1c   : > { %v247_v35 = vadd.f32 %v242_v27, %v237_v31  ;;  %v238_v36 = vadd.f32 %v234_v29, %v228_v32 }
  0x1e   : > { %v257_v38 = vadd.f32 %v252_v33, %v247_v35  ;;  %v248_v39 = vadd.f32 %v244_v34, %v238_v36 }
  0x20   : > { %v259_v40 = vmul.f32 0.2, %v257_v38  ;;  %v258_v41 = vadd.f32 %v254_v37, %v248_v39 }
  0x22   : > { %262 = vst.msk [vmem:[%s187_s19] sm:$0xff] %vm261_vm5, %v259_v40  ;;  %v260_v42 = vmul.f32 0.2, %v258_v41  ;;  %v264_v43 = vsub.f32 %v196_v4, %v259_v40 }
  0x24   : > { %263 = vst.msk [vmem:[%s187_s19 + $0x8] sm:$0xff] %vm261_vm5, %v260_v42  ;;  %266 = vst.msk [vmem:[%s195_s22] sm:$0xff] %vm261_vm5, %v264_v43  ;;  %v265_v44 = vsub.f32 %v197_v5, %v260_v42 }
  0x26   : > { %267 = vst.msk [vmem:[%s195_s22 + $0x8] sm:$0xff] %vm261_vm5, %v265_v44 }
  0x27 PF: > { %s13_s11 = sadd.s32 1, %s460_s11   ;;  %s527_s9 = smov %s456_s10 }
  0x28   : > { %p10_p5 = scmp.ge.s32.totalorder %s13_s11, 4   ;;  %s528_s10 = smov %s530_s12 }
  0x2a   :  { %12 = sbr.rel (!%p10_p5) target bundleno = 2 (0x2), region = 66 }

</bundles_post_ra>
